<compile_context>
chip_gen: v7x
topology: tpu7x:2x2x1
jax: 0.10.0
libtpu: 0.0.40
codegen_flags: <defaults>
</compile_context>

<pallas_src>
import functools

import jax
import jax.numpy as jnp
from jax.experimental import pallas as pl
from jax.experimental.pallas import tpu as pltpu

_LANES = 128
_SUBLANES = 8
_MAX_TILE_ROWS = 1024   # 1024 x 128 f32 = 512 KiB per input block per step
_NUM_CORES = 2          # megacore split on v7x; plain 2-step loop elsewhere


def _round_up(x, m):
    return ((x + m - 1) // m) * m


def _cdiv(a, b):
    return -(-a // b)


def _grandfu_kernel(a_ref, b_ref, f_ref, ma_ref, mb_ref, o_ref, *,
                    tile_rows, tiles_per_core, total_rows, need_mask):
    c = pl.program_id(0)   # core (parallel) axis
    i = pl.program_id(1)   # row-tile (arbitrary / reduction) axis

    @pl.when(i == 0)
    def _():
        o_ref[...] = jnp.zeros_like(o_ref)

    a = a_ref[...].astype(jnp.float32)
    b = b_ref[...].astype(jnp.float32)
    f = f_ref[...].astype(jnp.float32)
    ma = ma_ref[...].astype(jnp.float32)
    mb = mb_ref[...].astype(jnp.float32)

    val = jnp.abs(f * ma - a * ma) + jnp.abs(f * mb - b * mb)

    if need_mask:
        # Zero out rows that fall past the real data (clamped / ragged tiles).
        row0 = (c * tiles_per_core + i) * tile_rows
        row_idx = row0 + jax.lax.broadcasted_iota(
            jnp.int32, (tile_rows, _LANES), 0)
        val = jnp.where(row_idx < total_rows, val, 0.0)

    # Keep the accumulator wide: reduce only along the major (row-group) axis
    # (pure VPU adds); the cross-lane reduce happens once in the wrapper.
    o_ref[...] += jnp.sum(
        val.reshape(tile_rows // _SUBLANES, _SUBLANES, _LANES), axis=0)


def l_intensity_grandfu(image_a, image_b, image_fused,
                        gradient_a_mask, gradient_b_mask):
    """L1(fused*maskA, A*maskA) + L1(fused*maskB, B*maskB) as a scalar f32."""
    assert image_a.shape == image_b.shape == image_fused.shape
    assert gradient_a_mask.shape == image_a.shape
    assert gradient_b_mask.shape == image_a.shape
    n = int(image_a.size)

    chunk = _SUBLANES * _LANES          # 1024 elements
    padded = _round_up(n, chunk)

    def _prep(x):
        x = jnp.ravel(x)
        if padded != n:
            # Rare ragged fallback; zero padding contributes |0 - 0| = 0.
            x = jnp.pad(x, (0, padded - n))
        return x.reshape(padded // _LANES, _LANES)

    a2, b2, f2, ma2, mb2 = map(
        _prep, (image_a, image_b, image_fused, gradient_a_mask, gradient_b_mask))

    rows = padded // _LANES             # multiple of 8
    tile_rows = min(_MAX_TILE_ROWS,
                    _round_up(_cdiv(rows, _NUM_CORES), _SUBLANES))
    n_row_blocks = _cdiv(rows, tile_rows)
    tiles_per_core = _cdiv(n_row_blocks, _NUM_CORES)
    need_mask = (_NUM_CORES * tiles_per_core * tile_rows) != rows
    last_block = n_row_blocks - 1

    def in_map(c, i):
        # Clamp so logical tiles past the end re-read a valid block; the
        # in-kernel row mask zeroes their contribution.
        return (jnp.minimum(c * tiles_per_core + i, last_block), 0)

    tile_spec = pl.BlockSpec((tile_rows, _LANES), in_map)
    # One full (8,128) block per core -> unmasked, lane-dense stores; the
    # block index is independent of i so it acts as the VMEM accumulator.
    out_spec = pl.BlockSpec((_SUBLANES, _LANES), lambda c, i: (c, 0))

    kernel = functools.partial(
        _grandfu_kernel,
        tile_rows=tile_rows,
        tiles_per_core=tiles_per_core,
        total_rows=rows,
        need_mask=need_mask,
    )

    partials = pl.pallas_call(
        kernel,
        out_shape=jax.ShapeDtypeStruct((_NUM_CORES * _SUBLANES, _LANES),
                                       jnp.float32),
        grid_spec=pltpu.PrefetchScalarGridSpec(
            num_scalar_prefetch=0,
            grid=(_NUM_CORES, tiles_per_core),
            in_specs=[tile_spec] * 5,
            out_specs=out_spec,
        ),
        compiler_params=pltpu.CompilerParams(
            dimension_semantics=("parallel", "arbitrary")),
    )(a2, b2, f2, ma2, mb2)

    # LossA + LossB = (sumA + sumB) / numel
    return jnp.sum(partials) / jnp.float32(n)


if __name__ == "__main__":
    key = jax.random.PRNGKey(0)
    k1, k2, k3, k4, k5 = jax.random.split(key, 5)
    shape = (2, 4, 16, 16)  # NCHW
    image_a = jax.random.uniform(k1, shape, dtype=jnp.float32)
    image_b = jax.random.uniform(k2, shape, dtype=jnp.float32)
    image_fused = jax.random.uniform(k3, shape, dtype=jnp.float32)
    grad_a_mask = jax.random.uniform(k4, shape, dtype=jnp.float32)
    grad_b_mask = jax.random.uniform(k5, shape, dtype=jnp.float32)

    loss = l_intensity_grandfu(image_a, image_b, image_fused,
                               grad_a_mask, grad_b_mask)
    loss = jax.block_until_ready(loss)

    # Pure-JAX reference check (matches the PyTorch module).
    ref = (jnp.mean(jnp.abs(image_fused * grad_a_mask - image_a * grad_a_mask))
           + jnp.mean(jnp.abs(image_fused * grad_b_mask - image_b * grad_b_mask)))
    assert jnp.allclose(loss, ref, rtol=1e-5, atol=1e-6), (loss, ref)

    print("KERNEL_OK")
</pallas_src>

<mosaic_0001>
module attributes {stable_mosaic.version = 11 : i64} {
  func.func @_grandfu_kernel(%arg0: i32, %arg1: i32, %arg2: memref<8x128xf32, #tpu.memory_space<vmem>>, %arg3: memref<8x128xf32, #tpu.memory_space<vmem>>, %arg4: memref<8x128xf32, #tpu.memory_space<vmem>>, %arg5: memref<8x128xf32, #tpu.memory_space<vmem>>, %arg6: memref<8x128xf32, #tpu.memory_space<vmem>>, %arg7: memref<8x128xf32, #tpu.memory_space<vmem>>) attributes {dimension_semantics = [#tpu.dimension_semantics<parallel>, #tpu.dimension_semantics<arbitrary>], iteration_bounds = array<i64: 2, 1>, scalar_prefetch = 0 : i64, scratch_operands = 0 : i64, tpu.core_type = #tpu.core_type<tc>, window_params = [{transform_indices = @transform_0, window_bounds = array<i64: 8, 128>}, {transform_indices = @transform_1, window_bounds = array<i64: 8, 128>}, {transform_indices = @transform_2, window_bounds = array<i64: 8, 128>}, {transform_indices = @transform_3, window_bounds = array<i64: 8, 128>}, {transform_indices = @transform_4, window_bounds = array<i64: 8, 128>}, {transform_indices = @transform_5, window_bounds = array<i64: 8, 128>}]} {
    %c0_i32 = arith.constant 0 : i32
    %0 = arith.cmpi eq, %arg1, %c0_i32 : i32
    %1 = arith.extui %0 : i1 to i32
    %c0_i32_0 = arith.constant 0 : i32
    %2 = arith.cmpi ne, %1, %c0_i32_0 : i32
    scf.if %2 {
      %cst_14 = arith.constant 0.000000e+00 : f32
      %22 = vector.broadcast %cst_14 : f32 to vector<8x128xf32>
      %c0_15 = arith.constant 0 : index
      %c0_16 = arith.constant 0 : index
      %23 = vector.load %arg7[%c0_15, %c0_16] : memref<8x128xf32, #tpu.memory_space<vmem>>, vector<8x128xf32>
      tpu.vector_store %arg7[%c0_15, %c0_16], %22 {strides = array<i32>} : memref<8x128xf32, #tpu.memory_space<vmem>>, vector<8x128xf32>,
    } else {
    }
    %c0 = arith.constant 0 : index
    %c0_1 = arith.constant 0 : index
    %3 = vector.load %arg2[%c0, %c0_1] : memref<8x128xf32, #tpu.memory_space<vmem>>, vector<8x128xf32>
    %c0_2 = arith.constant 0 : index
    %c0_3 = arith.constant 0 : index
    %4 = vector.load %arg3[%c0_2, %c0_3] : memref<8x128xf32, #tpu.memory_space<vmem>>, vector<8x128xf32>
    %c0_4 = arith.constant 0 : index
    %c0_5 = arith.constant 0 : index
    %5 = vector.load %arg4[%c0_4, %c0_5] : memref<8x128xf32, #tpu.memory_space<vmem>>, vector<8x128xf32>
    %c0_6 = arith.constant 0 : index
    %c0_7 = arith.constant 0 : index
    %6 = vector.load %arg5[%c0_6, %c0_7] : memref<8x128xf32, #tpu.memory_space<vmem>>, vector<8x128xf32>
    %c0_8 = arith.constant 0 : index
    %c0_9 = arith.constant 0 : index
    %7 = vector.load %arg6[%c0_8, %c0_9] : memref<8x128xf32, #tpu.memory_space<vmem>>, vector<8x128xf32>
    %8 = arith.mulf %5, %6 : vector<8x128xf32>
    %9 = arith.mulf %3, %6 : vector<8x128xf32>
    %10 = arith.subf %8, %9 : vector<8x128xf32>
    %11 = math.absf %10 : vector<8x128xf32>
    %12 = arith.mulf %5, %7 : vector<8x128xf32>
    %13 = arith.mulf %4, %7 : vector<8x128xf32>
    %14 = arith.subf %12, %13 : vector<8x128xf32>
    %15 = math.absf %14 : vector<8x128xf32>
    %16 = arith.addf %11, %15 : vector<8x128xf32>
    %c0_10 = arith.constant 0 : index
    %c0_11 = arith.constant 0 : index
    %17 = vector.load %arg7[%c0_10, %c0_11] : memref<8x128xf32, #tpu.memory_space<vmem>>, vector<8x128xf32>
    %18 = vector.shape_cast %16 : vector<8x128xf32> to vector<1x8x128xf32>
    %cst = arith.constant dense<0.000000e+00> : vector<8x128xf32>
    %19 = vector.multi_reduction <add>, %18, %cst [0] : vector<1x8x128xf32> to vector<8x128xf32>
    %20 = arith.addf %17, %19 : vector<8x128xf32>
    %c0_12 = arith.constant 0 : index
    %c0_13 = arith.constant 0 : index
    %21 = vector.load %arg7[%c0_12, %c0_13] : memref<8x128xf32, #tpu.memory_space<vmem>>, vector<8x128xf32>
    tpu.vector_store %arg7[%c0_12, %c0_13], %20 {strides = array<i32>} : memref<8x128xf32, #tpu.memory_space<vmem>>, vector<8x128xf32>,
    return
  }
  func.func @transform_0(%arg0: i32, %arg1: i32) -> (i32, i32) {
    %c1_i32 = arith.constant 1 : i32
    %0 = arith.muli %arg0, %c1_i32 : i32
    %1 = arith.addi %0, %arg1 : i32
    %c1_i32_0 = arith.constant 1 : i32
    %2 = arith.minsi %1, %c1_i32_0 : i32
    %c0_i32 = arith.constant 0 : i32
    %c0_i32_1 = arith.constant 0 : i32
    return %2, %c0_i32 : i32, i32
  }
  func.func @transform_1(%arg0: i32, %arg1: i32) -> (i32, i32) {
    %c1_i32 = arith.constant 1 : i32
    %0 = arith.muli %arg0, %c1_i32 : i32
    %1 = arith.addi %0, %arg1 : i32
    %c1_i32_0 = arith.constant 1 : i32
    %2 = arith.minsi %1, %c1_i32_0 : i32
    %c0_i32 = arith.constant 0 : i32
    %c0_i32_1 = arith.constant 0 : i32
    return %2, %c0_i32 : i32, i32
  }
  func.func @transform_2(%arg0: i32, %arg1: i32) -> (i32, i32) {
    %c1_i32 = arith.constant 1 : i32
    %0 = arith.muli %arg0, %c1_i32 : i32
    %1 = arith.addi %0, %arg1 : i32
    %c1_i32_0 = arith.constant 1 : i32
    %2 = arith.minsi %1, %c1_i32_0 : i32
    %c0_i32 = arith.constant 0 : i32
    %c0_i32_1 = arith.constant 0 : i32
    return %2, %c0_i32 : i32, i32
  }
  func.func @transform_3(%arg0: i32, %arg1: i32) -> (i32, i32) {
    %c1_i32 = arith.constant 1 : i32
    %0 = arith.muli %arg0, %c1_i32 : i32
    %1 = arith.addi %0, %arg1 : i32
    %c1_i32_0 = arith.constant 1 : i32
    %2 = arith.minsi %1, %c1_i32_0 : i32
    %c0_i32 = arith.constant 0 : i32
    %c0_i32_1 = arith.constant 0 : i32
    return %2, %c0_i32 : i32, i32
  }
  func.func @transform_4(%arg0: i32, %arg1: i32) -> (i32, i32) {
    %c1_i32 = arith.constant 1 : i32
    %0 = arith.muli %arg0, %c1_i32 : i32
    %1 = arith.addi %0, %arg1 : i32
    %c1_i32_0 = arith.constant 1 : i32
    %2 = arith.minsi %1, %c1_i32_0 : i32
    %c0_i32 = arith.constant 0 : i32
    %c0_i32_1 = arith.constant 0 : i32
    return %2, %c0_i32 : i32, i32
  }
  func.func @transform_5(%arg0: i32, %arg1: i32) -> (i32, i32) {
    %c0_i32 = arith.constant 0 : i32
    %c0_i32_0 = arith.constant 0 : i32
    return %arg0, %c0_i32 : i32, i32
  }
}

</mosaic_0001>

<bundles_post_ra>
// kernel: tpu_custom_call.1
= control target key start
LH: loop header
LB: loop body
LE: loop exit
PB: predicated region body
PF: predicated region fallthrough
CT: control target
= control target key end

     0   :  { %s1433_s0 = inlined_call_operand.hbm [shape: f32[16,128], index: 0, kind: input, shape index: {}]   ;;  %s1434_s1 = inlined_call_operand.hbm [shape: f32[16,128], index: 1, kind: input, shape index: {}]   ;;  %s1435_s2 = inlined_call_operand.hbm [shape: f32[16,128], index: 2, kind: input, shape index: {}]   ;;  %s1436_s3 = inlined_call_operand.hbm [shape: f32[16,128], index: 3, kind: input, shape index: {}]   ;;  %s1437_s4 = inlined_call_operand.hbm [shape: f32[16,128], index: 4, kind: input, shape index: {}]   ;;  %s1438_s5 = inlined_call_operand.hbm [shape: f32[16,128], index: 5, kind: output, shape index: {}]  }
   0x1   :  { %1454 = sst [smem:[#allocation25_spill]] %s1433_s0 }
   0x2   :  { %1455 = sst [smem:[#allocation26_spill]] %s1434_s1 }
   0x3   :  { %1456 = sst [smem:[#allocation27_spill]] %s1436_s3 }
   0x4   :  { %10 = vsyncpa [#allocation3], 0 }
   0x5   :  { %12 = vsyncpa [#allocation3 + $0x1], 0 }
   0x6   :  { %13 = vsyncpa [#allocation6], 0 }
   0x7   :  { %15 = vsyncpa [#allocation6 + $0x1], 0 }
   0x8   :  { %16 = vsyncpa [#allocation9], 0 }
   0x9   :  { %18 = vsyncpa [#allocation9 + $0x1], 0 }
   0xa   :  { %19 = vsyncpa [#allocation4], 0 }
   0xb   :  { %21 = vsyncpa [#allocation4 + $0x1], 0  ;;  %s1089_s18 = smov 0   ;;  %s1091_s19 = smov 0  }
   0xc   :  { %s1093_s20 = smov 0   ;;  %s1095_s21 = smov 0  }
   0xd   :  { %s1097_s22 = smov 0   ;;  %s1099_s23 = smov 0  }
   0xe   :  { %s1101_s24 = smov 0   ;;  %s1103_s25 = smov 0  }
   0xf   :  { %s1105_s26 = smov 0  }
  0x10 LB: > { %1457 = sst [smem:[#allocation16_spill]] %s1019_s18  ;;  %s1133_s27 = sadd.s32 4294967295, %s1051_s26   ;;  %s1051_s26 = sphi %s1105_s26, %s27_s26   ;;  %s1047_s25 = sphi %s1103_s25, %s1495_s25   ;;  %s1043_s24 = sphi %s1101_s24, %s1494_s24   ;;  %s1039_s23 = sphi %s1099_s23, %s1493_s23   ;;  %s1035_s22 = sphi %s1097_s22, %s1499_s22   ;;  %s1031_s21 = sphi %s1095_s21, %s1498_s21   ;;  %s1027_s20 = sphi %s1093_s20, %s1491_s20   ;;  %s1023_s19 = sphi %s1091_s19, %s1497_s19   ;;  %s1019_s18 = sphi %s1089_s18, %s1496_s18  }
  0x11   : > { %1458 = sst [smem:[#allocation17_spill]] %s1027_s20  ;;  %s656_s28 = sadd.s32 4294967294, %s1051_s26  }
  0x12   : > { %1459 = sst [smem:[#allocation18_spill]] %s1039_s23  ;;  %s39_s29 = sadd.s32 1, %s1047_s25 }
  0x13   : > { %1460 = sst [smem:[#allocation19_spill]] %s1047_s25  ;;  %p44_p0 = scmp.lt.s32.totalorder %s1047_s25, 1 }
  0x14   : > { %1461 = sst [smem:[#allocation20_spill]] %s1051_s26  ;;  %p41_p1 = scmp.ge.s32.totalorder %s39_s29, 2 }
  0x15   : > { %s52_s30 = sadd.s32 1, %s1039_s23  ;;  %p59_p2 = scmp.ne.s32.totalorder %s1039_s23, %s1035_s22 }
  0x16   : > { %s45_s6 = scalar_select %p44_p0, %s1047_s25, 1 }
  0x17   : > { %s1501_s29 = smov (%p41_p1, %s39_s29), 0  ;;  %p60_p3 = scmp.eq.s32.totalorder %s1051_s26, 0 }
  0x18   : > { %1462 = sst [smem:[#allocation21_spill]] %s1501_s29  ;;  %p47_p4 = scmp.lt.s32.totalorder %s1501_s29, 1 }
  0x19   : > { %p65_p5 = scmp.ne.s32.totalorder %s1035_s22, %s1031_s21  ;;  %p1147_p6 = por %p60_p3, %p59_p2 }
  0x1a   : > { %p66_p7 = scmp.eq.s32.totalorder %s1133_s27, 0  ;;  %s203_s10 = ssub.s32 %s1047_s25, %s1501_s29 }
  0x1b   : > { %s48_s8 = scalar_select %p47_p4, %s1501_s29, 1 }
  0x1c   : > { %p1153_p8 = por %p66_p7, %p65_p5  ;;  %p204_p9 = scmp.eq.s32.totalorder %s203_s10, 0 }
  0x1d   : > { %s49_s11 = ssub.s32 %s45_s6, %s48_s8  ;;  %s206_s12 = sadd.s32 1, %s1027_s20 }
  0x1e   : > { %s1464_s9 = scalar_select %p1153_p8, 1, 0 }
  0x1f   : > { %p50_p10 = scmp.eq.s32.totalorder %s49_s11, 0  ;;  %p216_p11 = scmp.ne.s32.totalorder %s1027_s20, %s1023_s19 }
  0x20   : > { %s1161_s13 = scalar_select %p204_p9, %s1027_s20, %s206_s12  }
  0x21   : > { %s1164_s14 = scalar_select %p50_p10, %s1039_s23, %s52_s30  }
  0x22   : > { %1465 = sst [smem:[#allocation22_spill]] %s1161_s13  ;;  %p217_p12 = scmp.eq.s32.totalorder %s1133_s27, 1 }
  0x23   : > { %1466 = sst [smem:[#allocation23_spill]] %s1164_s14  ;;  %p222_p13 = scmp.ne.s32.totalorder %s1023_s19, %s1019_s18 }
  0x24   : > { %p223_p0 = scmp.eq.s32.totalorder %s656_s28, 1  ;;  %p1171_p1 = por %p217_p12, %p216_p11 }
  0x25   : > { %p712_p4 = scmp.lt.s32.totalorder %s1051_s26, 2  ;;  %s1439_s17 = sand.u32 1, %s1039_s23  }
  0x26   : > { %s1467_s15 = scalar_select %p1171_p1, 1, 0 }
  0x27   : > { %p1176_p3 = por %p223_p0, %p222_p13  ;;  %s1182_s21 = sshll.u32 %s45_s6, 7 }
  0x28   : > { %s1186_s30 = sshll.u32 %s1439_s17, 3  ;;  %p1190_p5 = pnand %p712_p4, %p1147_p6 }
  0x29   : > { %s1468_s16 = scalar_select %p1176_p3, 1, 0 }
  0x2a   : > { %s1470_s28 = scalar_select %p1190_p5, 1, 0 }
  0x2b   : > { %1469 = sst [smem:[#allocation24_spill]] %s1468_s16  ;;  %s1442_s8 = sand.u32 1, %s1051_s26  }
  0x2c   : > { %s1471_s1 = sld [smem:[#allocation26_spill]]  ;;  %s268_s6 = scalar_lea.vmem [#allocation5], %s1186_s30 }
  0x2d   : > { %s278_s17 = sshll.u32 %s268_s6, 4  ;;  %s1207_s7 = scalar_lea.sflag [#allocation6], %s1442_s8  ;;  %s1202_s17 = int_to_ptr.vmem [resolvable:$true] %s278_s17 }
  0x2e   : > { %p1213_p9 = pneg %p1190_p5 }
  0x32   : > { %s1199_s12 = scalar_lea.hbm %s1471_s1, %s1182_s21  ;;  %s792_s6 = scalar_lea.hbm %s1471_s1, 256 }
  0x33   : > { %s787_s29 = scalar_lea.hbm %s1199_s12, 128  ;;  %p793_p12 = scmp.lt.u32.totalorder %s1199_s12, %s1471_s1 }
  0x34   : > { %p788_p6 = scmp.ne.s32.totalorder %s1199_s12, %s787_s29  ;;  %p794_p13 = scmp.lt.u32.totalorder %s792_s6, %s787_s29 }
  0x35   : > { %p796_p4 = scmp.lt.u32.totalorder %s787_s29, %s1199_s12 }
  0x36   : > { %p790_p10 = pnand %p1213_p9, %p788_p6  ;;  %p795_p0 = por %p794_p13, %p793_p12 }
  0x38   : > { %p791_p11 = pneg %p790_p10  ;;  %p797_p2 = por %p796_p4, %p795_p0 }
  0x3a   : > { %p798_p7 = pnand %p797_p2, %p791_p11 }
  0x3c   : > { %801 = shalt.err (!%p798_p7)
}
  0x3d   : > { %s802_s8 = scalar_lea.vmem %s1202_s17, 128  ;;  %s1053_s10 = smov [#allocation5]  }
  0x3e   : > { %p803_p6 = scmp.ne.s32.totalorder %s1202_s17, %s802_s8  ;;  %s807_s11 = sshll.u32 %s1053_s10, 4  ;;  %s808_s11 = int_to_ptr.vmem [resolvable:$false] %s807_s11 }
  0x3f   : > { %s809_s13 = scalar_lea.vmem %s808_s11, 256  ;;  %p810_p1 = scmp.lt.s32.totalorder %s1202_s17, %s808_s11 }
  0x40   : > { %p805_p10 = pnand %p803_p6, %p1213_p9  ;;  %p811_p8 = scmp.lt.s32.totalorder %s809_s13, %s802_s8 }
  0x42   : > { %p806_p3 = pneg %p805_p10  ;;  %p812_p12 = por %p811_p8, %p810_p1 }
  0x44   : > { %p813_p13 = pnand %p812_p12, %p806_p3 }
  0x46   : > { %816 = shalt.err (!%p813_p13)
}
  0x47   : > { %698 = dma.hbm_to_vmem [thread:$0]  (!%p1190_p5), %s1199_s12, 128, %s1202_s17, %s1207_s7  }
  0x48   : > { %p346_p2 = scmp.lt.s32.totalorder %s1051_s26, 3  ;;  %s1473_s3 = sld [smem:[#allocation27_spill]] }
  0x49   : > { %p1474_p8 = scmp.ge.s32.totalorder %s1051_s26, 1  ;;  %s310_s10 = scalar_lea.vmem [#allocation8], %s1186_s30 }
  0x4a   : > { %s320_s11 = sshll.u32 %s310_s10, 4  ;;  %s1476_s13 = sand.u32 1, %s1051_s26   ;;  %s321_s11 = int_to_ptr.vmem [resolvable:$true] %s320_s11 }
  0x4b   : > { %p1246_p1 = pnand %p1474_p8, %p346_p2  ;;  %s1253_s17 = scalar_lea.sflag [#allocation9], %s1476_s13 }
  0x4d   : > { %s1475_s6 = scalar_select %p1246_p1, 1, 0 }
  0x4e   : > { %s1242_s8 = scalar_lea.hbm %s1473_s3, %s1182_s21  ;;  %s822_s1 = scalar_lea.hbm %s1473_s3, 256 }
  0x4f   : > { %s817_s12 = scalar_lea.hbm %s1242_s8, 128  ;;  %p823_p0 = scmp.lt.u32.totalorder %s1242_s8, %s1473_s3 }
  0x50   : > { %p818_p3 = scmp.ne.s32.totalorder %s1242_s8, %s817_s12  ;;  %p824_p4 = scmp.lt.u32.totalorder %s822_s1, %s817_s12 }
  0x51   : > { %p826_p10 = scmp.lt.u32.totalorder %s817_s12, %s1242_s8 }
  0x52   : > { %p820_p7 = pnand %p818_p3, %p1213_p9  ;;  %p825_p6 = por %p824_p4, %p823_p0 }
  0x54   : > { %p821_p11 = pneg %p820_p7  ;;  %p827_p12 = por %p826_p10, %p825_p6 }
  0x56   : > { %p828_p13 = pnand %p827_p12, %p821_p11 }
  0x58   : > { %831 = shalt.err (!%p828_p13)
}
  0x59   : > { %s832_s10 = scalar_lea.vmem %s321_s11, 128  ;;  %s1054_s13 = smov [#allocation8]  }
  0x5a   : > { %p833_p2 = scmp.ne.s32.totalorder %s321_s11, %s832_s10  ;;  %s837_s26 = sshll.u32 %s1054_s13, 4  ;;  %s838_s26 = int_to_ptr.vmem [resolvable:$false] %s837_s26 }
  0x5b   : > { %s839_s29 = scalar_lea.vmem %s838_s26, 256  ;;  %p840_p7 = scmp.lt.s32.totalorder %s321_s11, %s838_s26 }
  0x5c   : > { %p835_p8 = pnand %p833_p2, %p1213_p9  ;;  %p841_p1 = scmp.lt.s32.totalorder %s839_s29, %s832_s10 }
  0x5e   : > { %p836_p3 = pneg %p835_p8  ;;  %p842_p5 = por %p841_p1, %p840_p7 }
  0x60   : > { %p843_p0 = pnand %p842_p5, %p836_p3 }
  0x62   : > { %846 = shalt.err (!%p843_p0)
}
  0x63   : > { %p1477_p4 = scmp.ne.s32.totalorder %s1470_s28, 0  ;;  %s1478_s0 = sld [smem:[#allocation25_spill]] }
  0x64   : > { %s247_s26 = scalar_lea.vmem [#allocation2], %s1186_s30  ;;  %s1286_s13 = scalar_lea.hbm %s1435_s2, %s1182_s21 }
  0x65   : > { %704 = dma.hbm_to_vmem [thread:$0]  (!%p1477_p4), %s1242_s8, 128, %s321_s11, %s1253_s17  }
  0x66   : > { %s257_s12 = sshll.u32 %s247_s26, 4  ;;  %s1479_s29 = sand.u32 1, %s1039_s23   ;;  %s1280_s12 = int_to_ptr.vmem [resolvable:$true] %s257_s12 }
  0x67   : > { %s244_s8 = scalar_lea.sflag [#allocation3], %s1479_s29 }
  0x69   : > { %s1277_s16 = scalar_lea.hbm %s1478_s0, %s1182_s21  ;;  %s852_s3 = scalar_lea.hbm %s1478_s0, 256 }
  0x6a   : > { %s847_s11 = scalar_lea.hbm %s1277_s16, 128  ;;  %p853_p6 = scmp.lt.u32.totalorder %s1277_s16, %s1478_s0 }
  0x6b   : > { %p848_p5 = scmp.ne.s32.totalorder %s1277_s16, %s847_s11  ;;  %p854_p10 = scmp.lt.u32.totalorder %s852_s3, %s847_s11 }
  0x6c   : > { %p856_p13 = scmp.lt.u32.totalorder %s847_s11, %s1277_s16 }
  0x6d   : > { %p850_p1 = pnand %p848_p5, %p1213_p9  ;;  %p855_p12 = por %p854_p10, %p853_p6 }
  0x6f   : > { %p851_p11 = pneg %p850_p1  ;;  %p857_p2 = por %p856_p13, %p855_p12 }
  0x71   : > { %p858_p8 = pnand %p857_p2, %p851_p11 }
  0x73   : > { %861 = shalt.err (!%p858_p8)
}
  0x74   : > { %s862_s14 = scalar_lea.vmem %s1280_s12, 128  ;;  %s1055_s10 = smov [#allocation2]  }
  0x75   : > { %p863_p3 = scmp.ne.s32.totalorder %s1280_s12, %s862_s14  ;;  %s867_s29 = sshll.u32 %s1055_s10, 4  ;;  %s868_s29 = int_to_ptr.vmem [resolvable:$false] %s867_s29 }
  0x76   : > { %s869_s18 = scalar_lea.vmem %s868_s29, 256  ;;  %p870_p5 = scmp.lt.s32.totalorder %s1280_s12, %s868_s29 }
  0x77   : > { %p865_p7 = pnand %p863_p3, %p1213_p9  ;;  %p871_p1 = scmp.lt.s32.totalorder %s869_s18, %s862_s14 }
  0x79   : > { %p866_p0 = pneg %p865_p7  ;;  %p872_p6 = por %p871_p1, %p870_p5 }
  0x7b   : > { %p873_p10 = pnand %p872_p6, %p866_p0 }
  0x7d   : > { %876 = shalt.err (!%p873_p10)
}
  0x7e   : > { %695 = dma.hbm_to_vmem [thread:$0]  (!%p1477_p4), %s1277_s16, 128, %s1280_s12, %s244_s8  }
  0x7f   : > { %s289_s3 = scalar_lea.vmem [#allocation7], %s1186_s30  ;;  %s1316_s26 = scalar_lea.hbm %s1437_s4, %s1182_s21 }
  0x80   : > { %s299_s11 = sshll.u32 %s289_s3, 4  ;;  %s877_s14 = scalar_lea.hbm %s1286_s13, 128  ;;  %s300_s11 = int_to_ptr.vmem [resolvable:$true] %s299_s11 }
  0x81   : > { %p878_p11 = scmp.ne.s32.totalorder %s1286_s13, %s877_s14  ;;  %s882_s18 = scalar_lea.hbm %s1435_s2, 256 }
  0x82   : > { %p883_p2 = scmp.lt.u32.totalorder %s1286_s13, %s1435_s2  ;;  %p884_p8 = scmp.lt.u32.totalorder %s882_s18, %s877_s14 }
  0x83   : > { %p880_p12 = pnand %p878_p11, %p1213_p9  ;;  %p886_p7 = scmp.lt.u32.totalorder %s877_s14, %s1286_s13 }
  0x84   : > { %p885_p3 = por %p884_p8, %p883_p2 }
  0x85   : > { %p881_p13 = pneg %p880_p12 }
  0x86   : > { %p887_p0 = por %p886_p7, %p885_p3 }
  0x88   : > { %p888_p5 = pnand %p887_p0, %p881_p13 }
  0x8a   : > { %891 = shalt.err (!%p888_p5)
}
  0x8b   : > { %s892_s21 = scalar_lea.vmem %s300_s11, 128  ;;  %s1056_s16 = smov [#allocation7]  }
  0x8c   : > { %p893_p1 = scmp.ne.s32.totalorder %s300_s11, %s892_s21  ;;  %s897_s12 = sshll.u32 %s1056_s16, 4  ;;  %s898_s12 = int_to_ptr.vmem [resolvable:$false] %s897_s12 }
  0x8d   : > { %s899_s8 = scalar_lea.vmem %s898_s12, 256  ;;  %p900_p11 = scmp.lt.s32.totalorder %s300_s11, %s898_s12 }
  0x8e   : > { %p895_p6 = pnand %p893_p1, %p1213_p9  ;;  %p901_p12 = scmp.lt.s32.totalorder %s899_s8, %s892_s21 }
  0x90   : > { %p896_p10 = pneg %p895_p6  ;;  %p902_p4 = por %p901_p12, %p900_p11 }
  0x92   : > { %p903_p2 = pnand %p902_p4, %p896_p10 }
  0x94   : > { %906 = shalt.err (!%p903_p2)
}
  0x95   : > { %p1480_p8 = scmp.ne.s32.totalorder %s1470_s28, 0  ;;  %s331_s0 = scalar_lea.vmem [#allocation10], %s1186_s30 }
  0x96   : > { %s341_s23 = sshll.u32 %s331_s0, 4  ;;  %s907_s3 = scalar_lea.hbm %s1316_s26, 128  ;;  %s342_s23 = int_to_ptr.vmem [resolvable:$true] %s341_s23 }
  0x97   : > { %701 = dma.hbm_to_vmem [thread:$0]  (!%p1480_p8), %s1286_s13, 128, %s300_s11, %s1207_s7  }
  0x98   : > { %p908_p13 = scmp.ne.s32.totalorder %s1316_s26, %s907_s3  ;;  %s912_s14 = scalar_lea.hbm %s1437_s4, 256 }
  0x99   : > { %p913_p7 = scmp.lt.u32.totalorder %s1316_s26, %s1437_s4  ;;  %p914_p0 = scmp.lt.u32.totalorder %s912_s14, %s907_s3 }
  0x9a   : > { %p910_p3 = pnand %p908_p13, %p1213_p9  ;;  %p916_p1 = scmp.lt.u32.totalorder %s907_s3, %s1316_s26 }
  0x9b   : > { %p915_p5 = por %p914_p0, %p913_p7 }
  0x9c   : > { %p911_p4 = pneg %p910_p3 }
  0x9d   : > { %p917_p6 = por %p916_p1, %p915_p5 }
  0x9f   : > { %p918_p10 = pnand %p917_p6, %p911_p4 }
  0xa1   : > { %921 = shalt.err (!%p918_p10)
}
  0xa2   : > { %s922_s30 = scalar_lea.vmem %s342_s23, 128  ;;  %s1057_s7 = smov [#allocation10]  }
  0xa3   : > { %p923_p11 = scmp.ne.s32.totalorder %s342_s23, %s922_s30  ;;  %s927_s13 = sshll.u32 %s1057_s7, 4  ;;  %s928_s13 = int_to_ptr.vmem [resolvable:$false] %s927_s13 }
  0xa4   : > { %s929_s11 = scalar_lea.vmem %s928_s13, 256  ;;  %p930_p13 = scmp.lt.s32.totalorder %s342_s23, %s928_s13 }
  0xa5   : > { %p925_p12 = pnand %p923_p11, %p1213_p9  ;;  %p931_p3 = scmp.lt.s32.totalorder %s929_s11, %s922_s30 }
  0xa7   : > { %p926_p2 = pneg %p925_p12  ;;  %p932_p8 = por %p931_p3, %p930_p13 }
  0xa9   : > { %p933_p0 = pnand %p932_p8, %p926_p2 }
  0xab   : > { %936 = shalt.err (!%p933_p0)
}
  0xac   : > { %p1481_p7 = scmp.ne.s32.totalorder %s1470_s28, 0  ;;  %p1482_p4 = scmp.ne.s32.totalorder %s1475_s6, 0 }
  0xad   : > { %s352_s25 = sand.u32 (!%p1482_p4), 1, %s1035_s22   ;;  %p1483_p9 = scmp.ne.s32.totalorder (!%p1482_p4), %s1464_s9, 0 }
  0xae   : > { %707 = dma.hbm_to_vmem [thread:$0]  (!%p1481_p7), %s1316_s26, 128, %s342_s23, %s1253_s17  }
  0xaf   : > { %350 = sbr.rel (%p1482_p4) target bundleno = 216 (0xd8), region = 40  ;;  %s670_s18 = sshll.u32 (!%p1482_p4), %s352_s25, 3 }
  0xb0   : > { %s353_s21 = scalar_lea.sflag (!%p1482_p4), [#allocation3], %s352_s25  ;;  %s356_s16 = scalar_lea.vmem (!%p1482_p4), [#allocation2], %s670_s18 }
  0xb6   : > { %1002 = dma.done.wait (%p1483_p9), %s353_s21, 128  }
  0xb7   : > { %1004 = vsyncadd (%p1483_p9), %s353_s21, 4294967168  ;;  %s361_s28 = sand.u32 1, %s1133_s27   ;;  %s365_s8 = scalar_lea.vmem [#allocation5], %s670_s18 }
  0xb8   : > { %s362_s12 = scalar_lea.sflag [#allocation6], %s361_s28 }
  0xb9   : > { %1006 = dma.done.wait (%p1483_p9), %s362_s12, 256  }
  0xba   : > { %1008 = vsyncadd (%p1483_p9), %s362_s12, 4294967040  ;;  %s374_s6 = scalar_lea.vmem [#allocation7], %s670_s18  ;;  %s380_s17 = scalar_lea.sflag [#allocation9], %s361_s28 }
  0xbb   : > { %s383_s26 = scalar_lea.vmem [#allocation8], %s670_s18 }
  0xbc   : > { %1010 = dma.done.wait (%p1483_p9), %s380_s17, 256  }
  0xbd   : > { %1012 = vsyncadd (%p1483_p9), %s380_s17, 4294967040  ;;  %s436_s0 = sand.u32 1, %s1023_s19   ;;  %v459_v0 = vld [vmem:[%s356_s16] sm:$0xff]  ;;  %v460_v1 = vld [vmem:[%s365_s8] sm:$0xff]  ;;  %s392_s23 = scalar_lea.vmem [#allocation10], %s670_s18 }
  0xbe   : > { %v461_v2 = vld [vmem:[%s374_s6] sm:$0xff]  ;;  %s675_s27 = sshll.u32 %s436_s0, 3  ;;  %v462_v3 = vld [vmem:[%s383_s26] sm:$0xff]  ;;  %s677_s9 = sshll.u32 %s1043_s24, 7 }
  0xbf   : > { %v463_v4 = vld [vmem:[%s392_s23] sm:$0xff]  ;;  %v464_v5 = vmul.f32 %v462_v3, %v461_v2  ;;  %v465_v6 = vmul.f32 %v462_v3, %v459_v0  ;;  %s438_s3 = scalar_lea.vmem [#allocation11], %s675_s27  ;;  %s1376_s10 = scalar_lea.hbm %s1438_s5, %s677_s9 }
  0xc0   : > { %v468_v7 = vmul.f32 %v463_v4, %v461_v2  ;;  %v469_v8 = vmul.f32 %v463_v4, %v460_v1  ;;  %s491_s1 = sshll.u32 %s438_s3, 4  ;;  %s478_s29 = scalar_lea.sflag [#allocation4], %s436_s0  ;;  %s1378_s1 = int_to_ptr.vmem [resolvable:$true] %s491_s1 }
  0xc1   : > { %v466_v9 = vsub.f32 %v464_v5, %v465_v6  ;;  %s937_s30 = scalar_lea.vmem %s1378_s1, 128  ;;  %p1484_p5 = scmp.ne.s32.totalorder %s1467_s15, 0 }
  0xc2   : > { %v470_v10 = vsub.f32 %v468_v7, %v469_v8  ;;  %p938_p8 = scmp.ne.s32.totalorder %s1378_s1, %s937_s30  ;;  %s1058_s24 = smov [#allocation11]  }
  0xc3   : > { %v467_v11 = vand.u32 2147483647, %v466_v9  ;;  %s941_s7 = sshll.u32 %s1058_s24, 4  ;;  %s942_s7 = int_to_ptr.vmem [resolvable:$false] %s941_s7 }
  0xc4   : > { %v471_v12 = vand.u32 2147483647, %v470_v10  ;;  %p939_p1 = pnand %p938_p8, %p1484_p5  ;;  %s943_s13 = scalar_lea.vmem %s942_s7, 256 }
  0xc5   : > { %p944_p10 = scmp.lt.s32.totalorder %s1378_s1, %s942_s7  ;;  %p945_p11 = scmp.lt.s32.totalorder %s943_s13, %s937_s30 }
  0xc6   : > { %v472_v13 = vadd.f32 %v471_v12, %v467_v11  ;;  %p940_p6 = pneg %p939_p1 }
  0xc7   : > { %p946_p12 = por %p945_p11, %p944_p10 }
  0xc8   : > { %476 = vst [vmem:[%s438_s3] sm:$0xff] %v472_v13 }
  0xc9   : > { %p947_p2 = pnand %p946_p12, %p940_p6 }
  0xcb   : > { %950 = shalt.err (!%p947_p2)
}
  0xcc   : > { %s951_s11 = scalar_lea.hbm %s1376_s10, 128  ;;  %s955_s21 = scalar_lea.hbm %s1438_s5, 256 }
  0xcd   : > { %p952_p13 = scmp.ne.s32.totalorder %s1376_s10, %s951_s11  ;;  %p956_p7 = scmp.lt.u32.totalorder %s1376_s10, %s1438_s5 }
  0xce   : > { %p957_p4 = scmp.lt.u32.totalorder %s955_s21, %s951_s11  ;;  %p959_p8 = scmp.lt.u32.totalorder %s951_s11, %s1376_s10 }
  0xcf   : > { %p953_p3 = pnand %p952_p13, %p1484_p5 }
  0xd0   : > { %p958_p9 = por %p957_p4, %p956_p7 }
  0xd1   : > { %p954_p0 = pneg %p953_p3 }
  0xd2   : > { %p960_p1 = por %p959_p8, %p958_p9 }
  0xd4   : > { %p961_p6 = pnand %p960_p1, %p954_p0 }
  0xd6   : > { %964 = shalt.err (!%p961_p6)
}
  0xd7   : > { %690 = dma.vmem_to_hbm [thread:$0]  (%p1484_p5), %s1378_s1, 128, %s1376_s10, %s478_s29  }
  0xd8 PF: > { %s1485_s12 = sld [smem:[#allocation16_spill]]  ;;  %s1486_s8 = sld [smem:[#allocation24_spill]] }
  0xd9   : > { %s1487_s6 = sld [smem:[#allocation20_spill]] }
  0xde   : > { %s503_s17 = sand.u32 1, %s1485_s12   ;;  %p1488_p10 = scmp.ne.s32.totalorder %s1486_s8, 0 }
  0xdf   : > { %p1489_p11 = scmp.ge.s32.totalorder %s1487_s6, 2  ;;  %s504_s26 = scalar_lea.sflag [#allocation4], %s503_s17 }
  0xe1   : > { %p709_p12 = pnand %p1489_p11, %p1488_p10 }
  0xe3   : > { %1014 = dma.done.wait (!%p709_p12), %s504_s26, 128  }
  0xe4   : > { %1016 = vsyncadd (!%p709_p12), %s504_s26, 4294967168  ;;  %s27_s26 = sadd.s32 1, %s1487_s6   ;;  %s1490_s0 = sld [smem:[#allocation17_spill]] }
  0xe5   : > { %p24_p2 = scmp.ge.s32.totalorder %s27_s26, 4   ;;  %s1491_s20 = sld [smem:[#allocation22_spill]] }
  0xe6   : > { %s1492_s15 = sld [smem:[#allocation18_spill]]  ;;  %s1493_s23 = sld [smem:[#allocation23_spill]] }
  0xe7   : > { %s1494_s24 = sld [smem:[#allocation19_spill]]  ;;  %s1495_s25 = sld [smem:[#allocation21_spill]] }
  0xe8   : > { %s1496_s18 = smov %s1023_s19  ;;  %s1498_s21 = smov %s1035_s22 }
  0xe9   :  { %26 = sbr.rel (!%p24_p2) target bundleno = 16 (0x10), region = 137 }
  0xea   : > { %s1497_s19 = smov %s1490_s0 }
  0xec   : > { %s1499_s22 = smov %s1492_s15 }
  0xf0   :  { %509 = vsyncpa [#allocation3], 1 }
  0xf1   :  { %511 = vsyncpa [#allocation3 + $0x1], 1 }
  0xf2   :  { %512 = vsyncpa [#allocation6], 1 }
  0xf3   :  { %514 = vsyncpa [#allocation6 + $0x1], 1 }
  0xf4   :  { %515 = vsyncpa [#allocation9], 1 }
  0xf5   :  { %517 = vsyncpa [#allocation9 + $0x1], 1 }
  0xf6   :  { %518 = vsyncpa [#allocation4], 1 }
  0xf7   :  { %520 = vsyncpa [#allocation4 + $0x1], 1 }

</bundles_post_ra>
